<compile_context>
chip_gen: v7x
topology: tpu7x:2x2x1
jax: 0.10.0
libtpu: 0.0.40
codegen_flags: <defaults>
</compile_context>

<pallas_src>
import numpy as np
import jax
import jax.numpy as jnp
from jax.experimental import pallas as pl
from jax.experimental.pallas import tpu as pltpu

_SQRT3_2 = np.sqrt(3.0) / 2.0

# Pinchon-Hoggan J matrices: real-spherical-harmonic irrep of the pi rotation
# about the bisector of the y and z axes. Symmetric involutions, derived for l <= 2.
_J_MATRICES = {
    0: np.array([[1.0]], dtype=np.float32),
    1: np.array([[0.0, 1.0, 0.0],
                 [1.0, 0.0, 0.0],
                 [0.0, 0.0, -1.0]], dtype=np.float32),
    2: np.array([[0.0, 0.0, 0.0, -1.0, 0.0],
                 [0.0, 1.0, 0.0, 0.0, 0.0],
                 [0.0, 0.0, -0.5, 0.0, -_SQRT3_2],
                 [-1.0, 0.0, 0.0, 0.0, 0.0],
                 [0.0, 0.0, -_SQRT3_2, 0.0, 0.5]], dtype=np.float32),
}
# TODO(synk): J matrices for l > 2 come from the Pinchon-Hoggan data tables that
# lie_tools loads from a file; only l <= 2 are derived in-script.


def _round_up(x, m):
    return ((x + m - 1) // m) * m


def build_constants(degrees):
    """Per-row signed frequency f_p, in-block reversal index rev[p], block-diag J."""
    assert degrees <= 2, "only l <= 2 J matrices are provided in-script"
    M = (degrees + 1) ** 2
    freq = np.zeros((M,), np.float32)
    rev = np.zeros((M,), np.int64)
    J = np.zeros((M, M), np.float32)
    for l in range(degrees + 1):
        o = l * l
        dim = 2 * l + 1
        for i in range(dim):
            freq[o + i] = l - i            # torch.arange(l, -l-1, -1)
            rev[o + i] = o + (2 * l - i)   # reversed index within the block
        J[o:o + dim, o:o + dim] = _J_MATRICES[l]
    return freq, rev, J


def _kernel_constants(degrees, R):
    """Batch-invariant numpy constants for the trig-table / selection formulation."""
    freq, rev, J = build_constants(degrees)
    M = freq.shape[0]
    MR = M * R
    MRp = max(128, _round_up(MR, 128))
    TW = _round_up(1 + 6 * degrees, 8)       # trig-table width; column 0 == 1.0

    def col_cos(j, k):                       # column holding cos(k * a_j), k >= 1
        return 1 + j * 2 * degrees + 2 * (k - 1)

    # Selection matrices (0/+-1): lane p = q*R + r carries harmonic row q with
    # signed frequency f = freq[q]; cos(f a) = cos(|f| a), sin(f a) = sign(f) sin(|f| a).
    Sc = np.zeros((3, TW, MRp), np.float32)
    Ss = np.zeros((3, TW, MRp), np.float32)
    for q in range(M):
        f = float(freq[q])
        k = int(abs(f))
        for r in range(R):
            p = q * R + r
            for j in range(3):
                if k == 0:
                    Sc[j, 0, p] = 1.0        # cos(0)=1 comes from the constant column
                else:                        # sin(0)=0 -> Ss column stays zero
                    Sc[j, col_cos(j, k), p] = 1.0
                    Ss[j, col_cos(j, k) + 1, p] = float(np.sign(f))

    # Fused selection for the two Z rotations applied after the J contractions:
    # columns [c1 | s1 | c0 | s0], each MRp wide.
    Sel4 = np.concatenate([Sc[1], Ss[1], Sc[0], Ss[0]], axis=1)    # (TW, 4*MRp)

    # Fused J weights (right-multiplication form): vec(J Y) = vec(Y) @ (J (x) I_R)^T,
    # vec(P J Y) = vec(Y) @ ((P J) (x) I_R)^T.  Padding rows/cols stay zero.
    P = np.zeros((M, M), np.float32)
    P[np.arange(M), rev] = 1.0
    eyeR = np.eye(R, dtype=np.float32)
    Wjp = np.zeros((MRp, 2 * MRp), np.float32)
    Wjp[:MR, :MR] = np.ascontiguousarray(np.kron(J, eyeR).T)
    Wjp[:MR, MRp:MRp + MR] = np.ascontiguousarray(np.kron(P @ J, eyeR).T)

    return rev, Sc[2], Ss[2], Sel4, Wjp, MR, MRp, TW


def _action_kernel(tbl_ref, selw_ref, wjp_ref, out_ref):
    MRp = out_ref.shape[1]
    # One fused MXU dot: [ vec(Zc@H) | c1 | s1 | c0 | s0 ], all lane-dense.
    ts = jnp.dot(tbl_ref[...], selw_ref[...], preferred_element_type=jnp.float32)
    y = ts[:, 0 * MRp:1 * MRp]                     # Zc(gamma) @ H   (flattened)
    c1 = ts[:, 1 * MRp:2 * MRp]
    s1 = ts[:, 2 * MRp:3 * MRp]
    c0 = ts[:, 3 * MRp:4 * MRp]
    s0 = ts[:, 4 * MRp:5 * MRp]
    # Fused J contraction: one dot gives [J@. | P@J@.]; slices are 128-aligned.
    yy = jnp.dot(y, wjp_ref[...], preferred_element_type=jnp.float32)
    y = c1 * yy[:, :MRp] + s1 * yy[:, MRp:]        # Zb(beta) @ .
    yy = jnp.dot(y, wjp_ref[...], preferred_element_type=jnp.float32)
    out_ref[...] = c0 * yy[:, :MRp] + s0 * yy[:, MRp:]   # Za(alpha) @ .


def action_net_so3_forward(angles, item_rep, degrees, transpose=False,
                           batch_tile=1024):
    n, d = angles.shape
    assert d == 3, 'Input should be Euler angles.'
    M = (degrees + 1) ** 2
    R = item_rep.shape[1]
    assert item_rep.shape[0] == M

    rev, Sc2, Ss2, Sel4, Wjp_np, MR, MRp, TW = _kernel_constants(degrees, R)

    # item_rep-dependent weight: y0 = c2*vec(H) + s2*vec(P@H) == table @ W0.
    H = item_rep.astype(jnp.float32)
    Hrev = H[jnp.asarray(rev), :]
    hvec = jnp.zeros((MRp,), jnp.float32).at[:MR].set(H.reshape(-1))
    hrevvec = jnp.zeros((MRp,), jnp.float32).at[:MR].set(Hrev.reshape(-1))
    W0 = jnp.asarray(Sc2) * hvec[None, :] + jnp.asarray(Ss2) * hrevvec[None, :]
    selw = jnp.concatenate([W0, jnp.asarray(Sel4)], axis=1)        # (TW, 5*MRp)
    wjp = jnp.asarray(Wjp_np)                                      # (MRp, 2*MRp)

    ang = angles.astype(jnp.float32)
    if transpose:
        # D^T = Zc(-g) @ J @ Zb(-b) @ J @ Za(-a): reverse + negate angle columns.
        ang = -ang[:, ::-1]

    # Compact per-row trig table [1, cos(k*a_j), sin(k*a_j), ...]: the only
    # transcendentals in the whole forward (6*degrees per row, done by XLA).
    ks = jnp.arange(1, degrees + 1, dtype=jnp.float32)
    ka = ang[:, :, None] * ks[None, None, :]                       # (n, 3, deg)
    trig = jnp.stack([jnp.cos(ka), jnp.sin(ka)], axis=-1)          # (n, 3, deg, 2)
    table = jnp.concatenate(
        [jnp.ones((n, 1), jnp.float32),
         trig.reshape(n, 6 * degrees),
         jnp.zeros((n, TW - 1 - 6 * degrees), jnp.float32)], axis=1)

    # Batch tiling: TB multiple of 8; keep >= 2 grid steps when possible so the
    # "parallel" axis can be sharded across TensorCores on multi-TC chips (v7x).
    TB = _round_up(max(batch_tile, 8), 8)
    TB = min(TB, max(8, _round_up(-(-n // 2), 8)))
    n_pad = _round_up(n, TB)
    if n_pad != n:
        table = jnp.pad(table, ((0, n_pad - n), (0, 0)))

    flops = n_pad * (2 * TW * 5 * MRp + 2 * (2 * MRp * 2 * MRp))
    bytes_accessed = 4 * (n_pad * (TW + MRp) + TW * 5 * MRp + MRp * 2 * MRp)

    out = pl.pallas_call(
        _action_kernel,
        out_shape=jax.ShapeDtypeStruct((n_pad, MRp), jnp.float32),
        grid_spec=pltpu.PrefetchScalarGridSpec(
            num_scalar_prefetch=0,
            grid=(n_pad // TB,),
            in_specs=[
                pl.BlockSpec((TB, TW), lambda b: (b, 0)),        # per-row trig table
                pl.BlockSpec((TW, 5 * MRp), lambda b: (0, 0)),   # [W0 | c1 s1 c0 s0 selections]
                pl.BlockSpec((MRp, 2 * MRp), lambda b: (0, 0)),  # [(J x I)^T | (PJ x I)^T]
            ],
            out_specs=pl.BlockSpec((TB, MRp), lambda b: (b, 0)),
        ),
        compiler_params=pltpu.CompilerParams(
            dimension_semantics=("parallel",),
            vmem_limit_bytes=32 * 1024 * 1024),
        cost_estimate=pl.CostEstimate(flops=int(flops), transcendentals=0,
                                      bytes_accessed=int(bytes_accessed)),
    )(table, selw, wjp)

    # Module contract: (n, M*R). Padding lanes/rows are exactly zero, so this
    # slice is the only host post-op (consumers that can take (n_pad, 128)
    # directly may skip it).
    return out[:n, :MR]


def reference_forward(angles, item_rep, degrees, transpose=False):
    """Pure-JAX reference of lie_tools.block_wigner_matrix_multiply + view."""
    n = angles.shape[0]
    freq, rev, J = build_constants(degrees)
    M = freq.shape[0]
    diag = jnp.eye(M, dtype=jnp.float32)
    P = jnp.zeros((M, M), jnp.float32).at[jnp.arange(M), jnp.asarray(rev)].set(1.0)
    freq_rows = jnp.broadcast_to(jnp.asarray(freq)[:, None], (M, M))
    Jj = jnp.asarray(J)
    angles = angles.astype(jnp.float32)

    def zrot(a):
        fa = freq_rows[None] * a[:, None, None]
        return jnp.cos(fa) * diag + jnp.sin(fa) * P

    za, zb, zc = zrot(angles[:, 0]), zrot(angles[:, 1]), zrot(angles[:, 2])
    D = za @ Jj @ zb @ Jj @ zc
    if transpose:
        D = jnp.swapaxes(D, -2, -1)
    out = D @ item_rep.astype(jnp.float32)
    return out.reshape(n, -1)


if __name__ == "__main__":
    key = jax.random.PRNGKey(0)
    k_rep, k_ang = jax.random.split(key)

    degrees = 2
    rep_copies = 10
    M = (degrees + 1) ** 2

    # nn.Parameter(torch.randn((matrix_dims, rep_copies))) -> deterministic init
    item_rep = jax.random.normal(k_rep, (M, rep_copies), dtype=jnp.float32)

    # Case 1: n = 8, transpose = False
    n1 = 8
    angles1 = jax.random.uniform(k_ang, (n1, 3), dtype=jnp.float32,
                                 minval=-np.pi, maxval=np.pi)
    out1 = jax.block_until_ready(
        action_net_so3_forward(angles1, item_rep, degrees, transpose=False))
    ref1 = reference_forward(angles1, item_rep, degrees, transpose=False)
    assert out1.shape == (n1, M * rep_copies)
    np.testing.assert_allclose(np.asarray(out1), np.asarray(ref1),
                               rtol=1e-4, atol=1e-4)

    # Case 2: n = 12 (not a multiple of 8 -> exercises batch padding + 2-step grid),
    # transpose = True
    n2 = 12
    angles2 = jax.random.uniform(jax.random.fold_in(k_ang, 1), (n2, 3),
                                 dtype=jnp.float32, minval=-np.pi, maxval=np.pi)
    out2 = jax.block_until_ready(
        action_net_so3_forward(angles2, item_rep, degrees, transpose=True))
    ref2 = reference_forward(angles2, item_rep, degrees, transpose=True)
    assert out2.shape == (n2, M * rep_copies)
    np.testing.assert_allclose(np.asarray(out2), np.asarray(ref2),
                               rtol=1e-4, atol=1e-4)

    print("KERNEL_OK")
</pallas_src>

<mosaic_0001>
module attributes {stable_mosaic.version = 11 : i64} {
  func.func @_action_kernel(%arg0: i32, %arg1: memref<8x16xf32, #tpu.memory_space<vmem>>, %arg2: memref<16x640xf32, #tpu.memory_space<vmem>>, %arg3: memref<128x256xf32, #tpu.memory_space<vmem>>, %arg4: memref<8x128xf32, #tpu.memory_space<vmem>>) attributes {dimension_semantics = [#tpu.dimension_semantics<parallel>], iteration_bounds = array<i64: 1>, scalar_prefetch = 0 : i64, scratch_operands = 0 : i64, tpu.core_type = #tpu.core_type<tc>, window_params = [{transform_indices = @transform_0, window_bounds = array<i64: 8, 16>}, {pipeline_mode = #tpu.pipeline_mode<synchronous>, transform_indices = @transform_1, window_bounds = array<i64: 16, 640>}, {pipeline_mode = #tpu.pipeline_mode<synchronous>, transform_indices = @transform_2, window_bounds = array<i64: 128, 256>}, {transform_indices = @transform_3, window_bounds = array<i64: 8, 128>}]} {
    %c0 = arith.constant 0 : index
    %c0_0 = arith.constant 0 : index
    %0 = vector.load %arg1[%c0, %c0_0] : memref<8x16xf32, #tpu.memory_space<vmem>>, vector<8x16xf32>
    %c0_1 = arith.constant 0 : index
    %c0_2 = arith.constant 0 : index
    %1 = vector.load %arg2[%c0_1, %c0_2] : memref<16x640xf32, #tpu.memory_space<vmem>>, vector<16x640xf32>
    %cst = arith.constant dense<0.000000e+00> : vector<8x640xf32>
    %2 = tpu.matmul %0, %1, %cst {dimension_numbers = #tpu.dot_dimension_numbers<[1], [0], [0], [1], [0, 0, 1, 1], [], []>} : vector<8x16xf32>, vector<16x640xf32>, vector<8x640xf32> -> vector<8x640xf32>
    %3 = vector.extract_strided_slice %2 {offsets = [0, 0], sizes = [8, 128], strides = [1, 1]} : vector<8x640xf32> to vector<8x128xf32>
    %4 = vector.extract_strided_slice %2 {offsets = [0, 128], sizes = [8, 128], strides = [1, 1]} : vector<8x640xf32> to vector<8x128xf32>
    %5 = vector.extract_strided_slice %2 {offsets = [0, 256], sizes = [8, 128], strides = [1, 1]} : vector<8x640xf32> to vector<8x128xf32>
    %6 = vector.extract_strided_slice %2 {offsets = [0, 384], sizes = [8, 128], strides = [1, 1]} : vector<8x640xf32> to vector<8x128xf32>
    %7 = vector.extract_strided_slice %2 {offsets = [0, 512], sizes = [8, 128], strides = [1, 1]} : vector<8x640xf32> to vector<8x128xf32>
    %c0_3 = arith.constant 0 : index
    %c0_4 = arith.constant 0 : index
    %8 = vector.load %arg3[%c0_3, %c0_4] : memref<128x256xf32, #tpu.memory_space<vmem>>, vector<128x256xf32>
    %cst_5 = arith.constant dense<0.000000e+00> : vector<8x256xf32>
    %9 = tpu.matmul %3, %8, %cst_5 {dimension_numbers = #tpu.dot_dimension_numbers<[1], [0], [0], [1], [0, 0, 1, 1], [], []>} : vector<8x128xf32>, vector<128x256xf32>, vector<8x256xf32> -> vector<8x256xf32>
    %10 = vector.extract_strided_slice %9 {offsets = [0, 0], sizes = [8, 128], strides = [1, 1]} : vector<8x256xf32> to vector<8x128xf32>
    %11 = arith.mulf %4, %10 : vector<8x128xf32>
    %12 = vector.extract_strided_slice %9 {offsets = [0, 128], sizes = [8, 128], strides = [1, 1]} : vector<8x256xf32> to vector<8x128xf32>
    %13 = arith.mulf %5, %12 : vector<8x128xf32>
    %14 = arith.addf %11, %13 : vector<8x128xf32>
    %c0_6 = arith.constant 0 : index
    %c0_7 = arith.constant 0 : index
    %15 = vector.load %arg3[%c0_6, %c0_7] : memref<128x256xf32, #tpu.memory_space<vmem>>, vector<128x256xf32>
    %cst_8 = arith.constant dense<0.000000e+00> : vector<8x256xf32>
    %16 = tpu.matmul %14, %15, %cst_8 {dimension_numbers = #tpu.dot_dimension_numbers<[1], [0], [0], [1], [0, 0, 1, 1], [], []>} : vector<8x128xf32>, vector<128x256xf32>, vector<8x256xf32> -> vector<8x256xf32>
    %17 = vector.extract_strided_slice %16 {offsets = [0, 0], sizes = [8, 128], strides = [1, 1]} : vector<8x256xf32> to vector<8x128xf32>
    %18 = arith.mulf %6, %17 : vector<8x128xf32>
    %19 = vector.extract_strided_slice %16 {offsets = [0, 128], sizes = [8, 128], strides = [1, 1]} : vector<8x256xf32> to vector<8x128xf32>
    %20 = arith.mulf %7, %19 : vector<8x128xf32>
    %21 = arith.addf %18, %20 : vector<8x128xf32>
    %c0_9 = arith.constant 0 : index
    %c0_10 = arith.constant 0 : index
    %22 = vector.load %arg4[%c0_9, %c0_10] : memref<8x128xf32, #tpu.memory_space<vmem>>, vector<8x128xf32>
    tpu.vector_store %arg4[%c0_9, %c0_10], %21 {strides = array<i32>} : memref<8x128xf32, #tpu.memory_space<vmem>>, vector<8x128xf32>,
    return
  }
  func.func @transform_0(%arg0: i32) -> (i32, i32) {
    %c0_i32 = arith.constant 0 : i32
    %c0_i32_0 = arith.constant 0 : i32
    return %arg0, %c0_i32 : i32, i32
  }
  func.func @transform_1(%arg0: i32) -> (i32, i32) {
    %c0_i32 = arith.constant 0 : i32
    %c0_i32_0 = arith.constant 0 : i32
    %c0_i32_1 = arith.constant 0 : i32
    return %c0_i32, %c0_i32_0 : i32, i32
  }
  func.func @transform_2(%arg0: i32) -> (i32, i32) {
    %c0_i32 = arith.constant 0 : i32
    %c0_i32_0 = arith.constant 0 : i32
    %c0_i32_1 = arith.constant 0 : i32
    return %c0_i32, %c0_i32_0 : i32, i32
  }
  func.func @transform_3(%arg0: i32) -> (i32, i32) {
    %c0_i32 = arith.constant 0 : i32
    %c0_i32_0 = arith.constant 0 : i32
    return %arg0, %c0_i32 : i32, i32
  }
}

</mosaic_0001>

<bundles_post_ra>
// kernel: tpu_custom_call.1
= control target key start
LH: loop header
LB: loop body
LE: loop exit
PB: predicated region body
PF: predicated region fallthrough
CT: control target
= control target key end

     0   :  { %8 = vsyncpa [#allocation3], 0  ;;  %s775_s0 = inlined_call_operand.hbm [shape: f32[8,16], index: 0, kind: input, shape index: {}]   ;;  %s776_s1 = inlined_call_operand.hbm [shape: f32[16,640], index: 1, kind: input, shape index: {}]   ;;  %s777_s2 = inlined_call_operand.hbm [shape: f32[128,256], index: 2, kind: input, shape index: {}]   ;;  %s778_s3 = inlined_call_operand.hbm [shape: f32[8,128], index: 3, kind: output, shape index: {}]  }
   0x1   :  { %9 = vsyncpa [#allocation6], 0 }
   0x2   :  { %10 = vsyncpa [#allocation4], 0  ;;  %s671_s12 = smov [#allocation5]   ;;  %s577_s16 = scalar_lea.hbm %s776_s1, 1280 }
   0x3   :  { %s26_s13 = sshll.u32 %s671_s12, 4  ;;  %p578_p0 = scmp.ne.s32.totalorder %s776_s1, %s577_s16  ;;  %s27_s13 = int_to_ptr.vmem [resolvable:$true] %s26_s13 }
   0x4   :  { %p581_p1 = scmp.lt.u32.totalorder %s577_s16, %s776_s1 }
   0x6   :  { %p583_p2 = pnand %p581_p1, %p578_p0 }
   0x8   :  { %586 = shalt.err (!%p583_p2)
}
   0x9   :  { %s587_s21 = scalar_lea.vmem %s27_s13, 1280  ;;  %p592_p4 = scmp.lt.s32.totalorder %s27_s13, %s27_s13 }
   0xa   :  { %p588_p3 = scmp.ne.s32.totalorder %s27_s13, %s587_s21  ;;  %p593_p5 = scmp.lt.s32.totalorder %s587_s21, %s587_s21 }
   0xc   :  { %p594_p6 = por %p593_p5, %p592_p4 }
   0xe   :  { %p595_p7 = pnand %p594_p6, %p588_p3 }
  0x10   :  { %598 = shalt.err (!%p595_p7)
}
  0x11   :  { %s672_s22 = smov 640   ;;  %s673_s23 = smov 40  }
  0x12   :  { %32 = dma.hbm_to_vmem [thread:$0]  %s776_s1, 1280, %s27_s13, [#allocation6], %s672_s22, %s672_s22, %s673_s23  }
  0x13   :  { %s674_s26 = smov [#allocation2]   ;;  %s675_s28 = smov [#allocation7]  }
  0x14   :  { %s17_s27 = sshll.u32 %s674_s26, 4  ;;  %s38_s29 = sshll.u32 %s675_s28, 4  ;;  %s18_s27 = int_to_ptr.vmem [resolvable:$true] %s17_s27  ;;  %s39_s29 = int_to_ptr.vmem [resolvable:$true] %s38_s29 }
  0x15   :  { %s599_s5 = scalar_lea.hbm %s775_s0, 128 }
  0x16   :  { %p600_p8 = scmp.ne.s32.totalorder %s775_s0, %s599_s5  ;;  %p603_p9 = scmp.lt.u32.totalorder %s599_s5, %s775_s0 }
  0x18   :  { %p605_p10 = pnand %p603_p9, %p600_p8 }
  0x1a   :  { %608 = shalt.err (!%p605_p10)
}
  0x1b   :  { %s609_s1 = scalar_lea.vmem %s18_s27, 128  ;;  %p614_p12 = scmp.lt.s32.totalorder %s18_s27, %s18_s27 }
  0x1c   :  { %p610_p11 = scmp.ne.s32.totalorder %s18_s27, %s609_s1  ;;  %p615_p13 = scmp.lt.s32.totalorder %s609_s1, %s609_s1 }
  0x1e   :  { %p616_p0 = por %p615_p13, %p614_p12 }
  0x20   :  { %p617_p1 = pnand %p616_p0, %p610_p11 }
  0x22   :  { %620 = shalt.err (!%p617_p1)
}
  0x23   :  { %20 = dma.hbm_to_vmem [thread:$0]  %s775_s0, 128, %s18_s27, [#allocation3]  }
  0x24   :  { %s621_s14 = scalar_lea.hbm %s777_s2, 4096 }
  0x25   :  { %p622_p2 = scmp.ne.s32.totalorder %s777_s2, %s621_s14  ;;  %p625_p3 = scmp.lt.u32.totalorder %s621_s14, %s777_s2 }
  0x27   :  { %p627_p4 = pnand %p625_p3, %p622_p2 }
  0x29   :  { %630 = shalt.err (!%p627_p4)
}
  0x2a   :  { %s631_s19 = scalar_lea.vmem %s39_s29, 4096  ;;  %p636_p6 = scmp.lt.s32.totalorder %s39_s29, %s39_s29 }
  0x2b   :  { %p632_p5 = scmp.ne.s32.totalorder %s39_s29, %s631_s19  ;;  %p637_p7 = scmp.lt.s32.totalorder %s631_s19, %s631_s19 }
  0x2d   :  { %p638_p8 = por %p637_p7, %p636_p6 }
  0x2f   :  { %p639_p9 = pnand %p638_p8, %p632_p5 }
  0x31   :  { %642 = shalt.err (!%p639_p9)
}
  0x32   :  { %s676_s0 = smov 256   ;;  %s677_s20 = smov 16  }
  0x33   :  { %44 = dma.hbm_to_vmem [thread:$0]  %s777_s2, 4096, %s39_s29, [#allocation6], %s676_s0, %s676_s0, %s677_s20  }
  0x34   :  { %665 = dma.done.wait [#allocation3], 128  }
  0x35   :  { %666 = vsyncadd [#allocation3], 4294967168 }
  0x36   :  { %667 = dma.done.wait [#allocation6], 5376  }
  0x37   :  { %668 = vsyncadd [#allocation6], 4294961920  ;;  %v678_v0 = vmov 0.0   ;;  %v56_v1 = vld [vmem:[#allocation5 + $0x8] sm:$0xff]  ;;  %v61_v2 = vld [vmem:[#allocation5 + $0x30] sm:$0xff]  ;;  %vm65_vm0 = vcmask 130048  }
  0x38   :  { %133 = vmatprep.mubr.f32.mxu0 %v678_v0  ;;  %204 = vmatprep.mubr.f32.mxu1 %v678_v0  ;;  %v55_v3 = vld [vmem:[#allocation5] sm:$0xff]  ;;  %v491_v4 = vpack.c.bf16 %v61_v2, %v56_v1  ;;  %v60_v5 = vld [vmem:[#allocation5 + $0x28] sm:$0xff]  ;;  %v58_v6 = vld [vmem:[#allocation5 + $0x18] sm:$0xff]  ;;  %v679_v1 = vmov 0.0|0.0   ;;  %vm680_vm1 = vmmov 0   ;;  %s681_s2 = smov [#allocation8]  }
  0x39   :  { %v493_v7 = vpack.c.bf16 %v60_v5, %v55_v3  ;;  %v740_v8 = vld [vmem:[#allocation2] sm:$0xff]  ;;  %v63_v9 = vld [vmem:[#allocation5 + $0x40] sm:$0xff]  ;;  %v57_v10 = vld [vmem:[#allocation5 + $0x10] sm:$0xff]  ;;  %s468_s23 = sshll.u32 %s681_s2, 4  ;;  %s469_s23 = int_to_ptr.vmem [resolvable:$true] %s468_s23 }
  0x3a   :  { %v62_v11 = vld [vmem:[#allocation5 + $0x38] sm:$0xff]  ;;  %492 = vmatprep.subr.bf16.mxu0 %v491_v4  ;;  %v495_v12 = vpack.c.bf16 %v63_v9, %v58_v6  ;;  %v284_v15 = vld [vmem:[#allocation7 + $0x18] sm:$0xff]  ;;  %v281_v16 = vld [vmem:[#allocation7] sm:$0xff]  ;;  %s643_s24 = scalar_lea.vmem %s469_s23, 128  ;;  %p648_p11 = scmp.lt.s32.totalorder %s469_s23, %s469_s23 }
  0x3b   :  { %v497_v13 = vpack.c.bf16 %v62_v11, %v57_v10  ;;  %v282_v14 = vld [vmem:[#allocation7 + $0x8] sm:$0xff]  ;;  %494 = vmatpush1.bf16.msra.mxu0 %v493_v7  ;;  %v283_v18 = vld [vmem:[#allocation7 + $0x10] sm:$0xff]  ;;  %v288_v20 = vld [vmem:[#allocation7 + $0x38] sm:$0xff]  ;;  %p644_p10 = scmp.ne.s32.totalorder %s469_s23, %s643_s24  ;;  %p649_p12 = scmp.lt.s32.totalorder %s643_s24, %s643_s24 }
  0x3c   :  { %v742_v17 = vpack.c.bf16 %v284_v15, %v282_v14  ;;  %v286_v19 = vld [vmem:[#allocation7 + $0x28] sm:$0xff]  ;;  %496 = vmatprep.subr.bf16.mxu1 %v495_v12  ;;  %v744_v21 = vpack.c.bf16 %v283_v18, %v281_v16  ;;  %v285_v23 = vld [vmem:[#allocation7 + $0x20] sm:$0xff]  ;;  %v287_v24 = vld [vmem:[#allocation7 + $0x30] sm:$0xff]  ;;  %499 = vmatprep.subr.bf16.mxu0 %v679_v1 }
  0x3d   :  { %498 = vmatpush1.bf16.msra.mxu1 %v497_v13  ;;  %v749_v22 = vpack.c.bf16 %v288_v20, %v286_v19  ;;  %v290_v25 = vld [vmem:[#allocation7 + $0x48] sm:$0xff]  ;;  %v292_v26 = vld [vmem:[#allocation7 + $0x58] sm:$0xff]  ;;  %v508_v27 = vpack.c.bf16 %v287_v24, %v285_v23  ;;  %v289_v29 = vld [vmem:[#allocation7 + $0x40] sm:$0xff]  ;;  %p650_p13 = por %p649_p12, %p648_p11 }
  0x3e   :  { %478 = vmatmul.mubr.msk.f32.vlgmr.msra.gmra.mrb[0].mxu0 %vm65_vm0, %v740_v8  ;;  %503 = vmatprep.subr.bf16.mxu1 %v742_v17  ;;  %v510_v28 = vpack.c.bf16 %v292_v26, %v290_v25  ;;  %v291_v30 = vld [vmem:[#allocation7 + $0x50] sm:$0xff]  ;;  %v294_v31 = vld [vmem:[#allocation7 + $0x68] sm:$0xff]  ;;  %v296_v32 = vld [vmem:[#allocation7 + $0x78] sm:$0xff] }
  0x3f   :  { %v512_v33 = vpack.c.bf16 %v291_v30, %v289_v29  ;;  %v514_v34 = vpack.c.bf16 %v296_v32, %v294_v31  ;;  %v293_v35 = vld [vmem:[#allocation7 + $0x60] sm:$0xff]  ;;  %v295_v36 = vld [vmem:[#allocation7 + $0x70] sm:$0xff]  ;;  %v298_v37 = vld [vmem:[#allocation7 + $0x88] sm:$0xff]  ;;  %488 = vmatprep.mubr.msk.f32.mxu0 %vm680_vm1, %v678_v0  ;;  %p651_p0 = pnand %p650_p13, %p644_p10 }
  0x40   :  { %479 = vmatmul.mubr.msk.f32.vlgmr.msra.gmra.mrb[0].mxu1 %vm65_vm0, %v740_v8  ;;  %v300_v38 = vld [vmem:[#allocation7 + $0x98] sm:$0xff]  ;;  %v516_v39 = vpack.c.bf16 %v295_v36, %v293_v35  ;;  %v297_v41 = vld [vmem:[#allocation7 + $0x80] sm:$0xff]  ;;  %v299_v42 = vld [vmem:[#allocation7 + $0x90] sm:$0xff] }
  0x41   :  { %505 = vmatpush1.bf16.msra.mxu1 %v744_v21  ;;  %377 = vmatprep.mubr.f32.mxu1 %v678_v0  ;;  %v518_v40 = vpack.c.bf16 %v300_v38, %v298_v37  ;;  %v302_v43 = vld [vmem:[#allocation7 + $0xa8] sm:$0xff]  ;;  %v304_v44 = vld [vmem:[#allocation7 + $0xb8] sm:$0xff]  ;;  %v520_v45 = vpack.c.bf16 %v299_v42, %v297_v41  ;;  %v301_v47 = vld [vmem:[#allocation7 + $0xa0] sm:$0xff] }
  0x42   :  { %507 = vmatprep.subr.bf16.mxu1 %v749_v22  ;;  %v522_v46 = vpack.c.bf16 %v304_v44, %v302_v43  ;;  %v303_v48 = vld [vmem:[#allocation7 + $0xb0] sm:$0xff]  ;;  %v306_v49 = vld [vmem:[#allocation7 + $0xc8] sm:$0xff]  ;;  %v308_v50 = vld [vmem:[#allocation7 + $0xd8] sm:$0xff] }
  0x43   :  { %v524_v51 = vpack.c.bf16 %v303_v48, %v301_v47  ;;  %v526_v52 = vpack.c.bf16 %v308_v50, %v306_v49  ;;  %v305_v53 = vld [vmem:[#allocation7 + $0xc0] sm:$0xff]  ;;  %v307_v54 = vld [vmem:[#allocation7 + $0xd0] sm:$0xff]  ;;  %v310_v55 = vld [vmem:[#allocation7 + $0xe8] sm:$0xff] }
  0x44   :  { %v312_v56 = vld [vmem:[#allocation7 + $0xf8] sm:$0xff]  ;;  %v528_v57 = vpack.c.bf16 %v307_v54, %v305_v53  ;;  %v309_v59 = vld [vmem:[#allocation7 + $0xe0] sm:$0xff]  ;;  %v311_v60 = vld [vmem:[#allocation7 + $0xf0] sm:$0xff] }
  0x45   :  { %509 = vmatpush1.bf16.msra.mxu1 %v508_v27  ;;  %v530_v58 = vpack.c.bf16 %v312_v56, %v310_v55  ;;  %v532_v61 = vpack.c.bf16 %v311_v60, %v309_v59  ;;  %v59_v62 = vld [vmem:[#allocation5 + $0x20] sm:$0xff]  ;;  %v64_v63 = vld [vmem:[#allocation5 + $0x48] sm:$0xff] }
  0x46   :  { %511 = vmatprep.subr.bf16.mxu1 %v510_v28  ;;  %v500_v2 = vpack.c.bf16 %v64_v63, %v59_v62 }
  0x48   :  { %501 = vmatpush3.bf16.msra.mxu0 %v500_v2 }
  0x49   :  { %513 = vmatpush1.bf16.msra.mxu1 %v512_v33  ;;  %535 = vmatprep.subr.bf16.mxu0 %v742_v17 }
  0x4a   :  { %515 = vmatprep.subr.bf16.mxu1 %v514_v34 }
  0x4b   :  { %489 = vmatmul.mubr.msk.f32.vlgmr.msra.gmra.mrb[2].mxu0 %vm65_vm0, %v740_v8 }
  0x4c   :  { %537 = vmatpush1.bf16.msra.mxu0 %v744_v21  ;;  %451 = vmatprep.mubr.f32.mxu0 %v678_v0 }
  0x4d   :  { %517 = vmatpush1.bf16.msra.mxu1 %v516_v39  ;;  %539 = vmatprep.subr.bf16.mxu0 %v749_v22 }
  0x4e   :  { %519 = vmatprep.subr.bf16.mxu1 %v518_v40 }
  0x50   :  { %541 = vmatpush1.bf16.msra.mxu0 %v508_v27 }
  0x51   :  { %521 = vmatpush1.bf16.msra.mxu1 %v520_v45  ;;  %543 = vmatprep.subr.bf16.mxu0 %v510_v28 }
  0x52   :  { %523 = vmatprep.subr.bf16.mxu1 %v522_v46 }
  0x54   :  { %545 = vmatpush1.bf16.msra.mxu0 %v512_v33 }
  0x55   :  { %525 = vmatpush1.bf16.msra.mxu1 %v524_v51  ;;  %547 = vmatprep.subr.bf16.mxu0 %v514_v34 }
  0x56   :  { %527 = vmatprep.subr.bf16.mxu1 %v526_v52 }
  0x58   :  { %549 = vmatpush1.bf16.msra.mxu0 %v516_v39 }
  0x59   :  { %529 = vmatpush1.bf16.msra.mxu1 %v528_v57  ;;  %551 = vmatprep.subr.bf16.mxu0 %v518_v40 }
  0x5a   :  { %531 = vmatprep.subr.bf16.mxu1 %v530_v58 }
  0x5c   :  { %553 = vmatpush1.bf16.msra.mxu0 %v520_v45 }
  0x5d   :  { %533 = vmatpush1.bf16.msra.mxu1 %v532_v61  ;;  %555 = vmatprep.subr.bf16.mxu0 %v522_v46 }
  0x60   :  { %557 = vmatpush1.bf16.msra.mxu0 %v524_v51 }
  0x61   :  { %559 = vmatprep.subr.bf16.mxu0 %v526_v52 }
  0x64   :  { %561 = vmatpush1.bf16.msra.mxu0 %v528_v57 }
  0x65   :  { %563 = vmatprep.subr.bf16.mxu0 %v530_v58 }
  0x68   :  { %565 = vmatpush1.bf16.msra.mxu0 %v532_v61 }
 0x111   :  { %v135_v3 = vpop.f32.mrb[0].mxu0 }
 0x112   :  { %v137_v4 = vpop.f32.mrb[1].mxu0  ;;  %378 = vmatmul.mubr.f32.vlgmr.msra.gmra.mrb[2].mxu1 %v135_v3 }
 0x113   :  { %v206_v5 = vpop.f32.mrb[0].mxu1 }
 0x114   :  { %v208_v0 = vpop.f32.mrb[1].mxu1 }
 0x11e   :  { %v277_v6 = vpop.f32.mrb[2].mxu0 }
 0x11f   :  { %v490_v7 = vpop.f32.mrb[3].mxu0 }
 0x1e5   :  { %v379_v8 = vpop.f32.mrb[2].mxu1 }
 0x1e6   :  { %v384_v9 = vmul.f32 %v379_v8, %v137_v4  ;;  %v381_v10 = vpop.f32.mrb[3].mxu1 }
 0x1e7   :  { %v385_v11 = vmul.f32 %v381_v10, %v206_v5 }
 0x1e9   :  { %v386_v12 = vadd.f32 %v385_v11, %v384_v9 }
 0x1eb   :  { %452 = vmatmul.mubr.f32.vlgmr.msra.gmra.mrb[4].mxu0 %v386_v12 }
 0x2be   :  { %v453_v13 = vpop.f32.mrb[4].mxu0 }
 0x2bf   :  { %v458_v14 = vmul.f32 %v453_v13, %v208_v0  ;;  %v455_v15 = vpop.f32.mrb[5].mxu0 }
 0x2c0   :  { %v459_v16 = vmul.f32 %v455_v15, %v277_v6 }
 0x2c2   :  { %v460_v17 = vadd.f32 %v459_v16, %v458_v14 }
 0x2c4   :  { %461 = vst [vmem:[#allocation8] sm:$0xff] %v460_v17 }
 0x2c5   :  { %654 = shalt.err (!%p651_p0)
}
 0x2c6   :  { %s655_s27 = scalar_lea.hbm %s778_s3, 128 }
 0x2c7   :  { %p656_p1 = scmp.ne.s32.totalorder %s778_s3, %s655_s27  ;;  %p659_p2 = scmp.lt.u32.totalorder %s655_s27, %s778_s3 }
 0x2c9   :  { %p661_p3 = pnand %p659_p2, %p656_p1 }
 0x2cb   :  { %664 = shalt.err (!%p661_p3)
}
 0x2cc   :  { %471 = dma.vmem_to_hbm [thread:$0]  %s469_s23, 128, %s778_s3, [#allocation4]  }
 0x2cd   :  { %669 = dma.done.wait [#allocation4], 128  }
 0x2ce   :  { %670 = vsyncadd [#allocation4], 4294967168 }
 0x2cf   :  { %475 = vsyncpa [#allocation3], 1 }
 0x2d0   :  { %476 = vsyncpa [#allocation6], 1 }
 0x2d1   :  { %477 = vsyncpa [#allocation4], 1 }

</bundles_post_ra>
